<compile_context>
chip_gen: v5e
topology: v5e:2x2
jax: 0.10.0
libtpu: 0.0.40
codegen_flags: <defaults>
</compile_context>

<pallas_src>
import jax
import jax.numpy as jnp
from jax.experimental import pallas as pl
from jax.experimental.pallas import tpu as pltpu

LANE = 128
H_PAD = 128  # hidden width 100, zero-padded to one full lane tile


def _round_up(n, m):
    return ((n + m - 1) // m) * m


def _nn_fwd_kernel(x_ref, w1_ref, b1_ref, w2_ref, b2_ref, o_ref):
    """One batch tile: (BN-folded) Linear -> ReLU -> row-dot -> sigmoid.

    x_ref  : (TB, F)  input tile (BatchNorm already folded into w1/b1)
    w1_ref : (F, H)   folded first Linear weight  (H padded to 128)
    b1_ref : (1, H)   folded first Linear bias
    w2_ref : (1, H)   second Linear weight as a row (zero-padded)
    b2_ref : (1, 1)   second Linear bias (SMEM scalar)
    o_ref  : (1, TB)  lane-dense sigmoid output
    """
    # ---- Linear(F, H) + ReLU (MXU matmul, f32 accumulate) ----
    h = jnp.dot(x_ref[...], w1_ref[...], preferred_element_type=jnp.float32)
    h = jnp.maximum(h + b1_ref[...], 0.0)                        # (TB, H)

    # ---- Linear(H, 1): w2_row @ h^T on the MXU (which has huge slack).
    # The result is already lane-dense (1, TB): no sublane->lane relayout.
    y = jax.lax.dot_general(
        w2_ref[...], h, (((1,), (1,)), ((), ())),
        preferred_element_type=jnp.float32)                      # (1, TB)
    y = y + b2_ref[0, 0]

    # ---- sigmoid: exp lands on the EUP; exact reciprocal for closer parity
    # with the f32 PyTorch reference (negligible extra cost).
    o_ref[...] = pl.reciprocal(1.0 + jnp.exp(-y))


@jax.jit
def nn_forward(x, params):
    """x: (B, F) float32. Returns (B,) float32 (matches torch .view(-1))."""
    gamma, beta, w1, b1, w2, b2 = params
    B, F = x.shape
    H = w1.shape[1]                                   # 128 (hidden 100, zero-padded)
    eps = 1e-5

    # ---- BatchNorm1d (training mode) batch stats over the FULL batch,
    # computed in a single fused pass over x (one HBM read):
    #   var = E[x^2] - mean^2  (clamped at 0; cancellation only matters when
    #   |mean| >> std, acceptable for BN with eps=1e-5).
    # Then folded exactly into the first Linear:
    #   bn(x) @ w1 + b1 == x @ (s[:,None]*w1) + ((beta - mean*s) @ w1 + b1),
    #   s = gamma * rsqrt(var + eps)
    s1 = jnp.sum(x, axis=0)                                       # (F,)
    s2 = jnp.sum(x * x, axis=0)                                   # (F,)
    mean = s1 / B
    var = jnp.maximum(s2 / B - mean * mean, 0.0)                  # biased variance
    scale = gamma.reshape(-1) * jax.lax.rsqrt(var + eps)          # (F,)
    w1_eff = scale[:, None] * w1                                  # (F, H)
    b1_eff = ((beta.reshape(-1) - mean * scale) @ w1)[None, :] + b1   # (1, H)
    w2_row = w2.reshape(1, H)                                     # (1, H)

    # ---- Batch tile sizing (all shapes static under jit):
    #   * keep the double-buffered x tile around ~4 MiB so it fits v5e's
    #     16 MiB default scoped VMEM and v7x's 64 MiB physical VMEM for large F
    #   * small F (tiny weights) may go up to TB=1024 (v6e headroom)
    #   * no jnp.pad of x: grid = cdiv(B, TB); Pallas handles the ragged last
    #     block (overhang rows are garbage and never observable after the
    #     wrapper slice).
    tb_from_vmem = max(LANE, ((4 * 1024 * 1024) // (2 * F * 4)) // LANE * LANE)
    tb_cap = 1024 if F <= 1024 else 512
    TB = min(tb_cap, tb_from_vmem, _round_up(B, LANE))
    if B > LANE:
        # Give the parallel batch axis >= 2 grid steps so both v7x TensorCores
        # get work (no effect on single-TC v5e/v6e).
        TB = max(LANE, min(TB, _round_up(-(-B // 2), LANE)))

    grid = pl.cdiv(B, TB)
    B_out = grid * TB          # lane-dense output, every block fully populated

    vmem_bytes = (2 * TB * F * 4        # double-buffered x tile
                  + 2 * F * H * 4       # w1 (resident, default double buffer)
                  + 4 * 8 * H * 4       # b1 / w2 small padded tiles
                  + 2 * TB * 4          # output double buffer
                  + 2 * TB * H * 4)     # h intermediate + headroom
    vmem_limit = int(min(64 * 1024 * 1024, max(16 * 1024 * 1024, 2 * vmem_bytes)))

    out = pl.pallas_call(
        _nn_fwd_kernel,
        out_shape=jax.ShapeDtypeStruct((1, B_out), jnp.float32),
        grid=(grid,),
        in_specs=[
            pl.BlockSpec((TB, F), lambda i: (i, 0)),    # streamed, double-buffered
            pl.BlockSpec((F, H), lambda i: (0, 0)),     # weights stay VMEM-resident
            pl.BlockSpec((1, H), lambda i: (0, 0)),
            pl.BlockSpec((1, H), lambda i: (0, 0)),
            pl.BlockSpec(memory_space=pltpu.MemorySpace.SMEM),  # scalar b2
        ],
        out_specs=pl.BlockSpec((1, TB), lambda i: (0, i)),      # lane-dense store
        compiler_params=pltpu.CompilerParams(
            dimension_semantics=("parallel",),   # shards batch tiles across TCs on v7x
            vmem_limit_bytes=vmem_limit,
        ),
    )(x, w1_eff, b1_eff, w2_row, b2)

    return out.reshape(-1)[:B]


def init_params(key, input_size, hidden=100, hidden_pad=H_PAD):
    """PyTorch-default init (uniform +-1/sqrt(fan_in)), with the hidden dim
    zero-padded to 128 so all vregs are full. Zero padding is numerically exact
    (padded hidden units contribute 0 before and after ReLU)."""
    k1, k2, k3, k4 = jax.random.split(key, 4)
    # BatchNorm1d affine params
    gamma = jnp.ones((1, input_size), jnp.float32)
    beta = jnp.zeros((1, input_size), jnp.float32)
    # Linear(input_size, hidden)  -- stored transposed vs torch: (in, out)
    bound1 = 1.0 / (input_size ** 0.5)
    w1 = jax.random.uniform(k1, (input_size, hidden), jnp.float32, -bound1, bound1)
    b1 = jax.random.uniform(k2, (1, hidden), jnp.float32, -bound1, bound1)
    # Linear(hidden, 1)
    bound2 = 1.0 / (hidden ** 0.5)
    w2 = jax.random.uniform(k3, (hidden, 1), jnp.float32, -bound2, bound2)
    b2 = jax.random.uniform(k4, (1, 1), jnp.float32, -bound2, bound2)
    # zero-pad hidden 100 -> 128
    pad = hidden_pad - hidden
    w1 = jnp.pad(w1, ((0, 0), (0, pad)))
    b1 = jnp.pad(b1, ((0, 0), (0, pad)))
    w2 = jnp.pad(w2, ((0, pad), (0, 0)))
    return gamma, beta, w1, b1, w2, b2


def _reference(x, params):
    """Pure-JAX reference of the PyTorch forward (training-mode BatchNorm)."""
    gamma, beta, w1, b1, w2, b2 = params
    mean = jnp.mean(x, axis=0)
    var = jnp.mean(jnp.square(x - mean), axis=0)
    xh = (x - mean) * jax.lax.rsqrt(var + 1e-5) * gamma + beta
    h = jnp.maximum(xh @ w1 + b1, 0.0)
    y = h @ w2 + b2
    return jax.nn.sigmoid(y).reshape(-1)


if __name__ == "__main__":
    key = jax.random.PRNGKey(0)
    kx, kp = jax.random.split(key)

    B, F = 8, 32
    x = jax.random.normal(kx, (B, F), jnp.float32)
    params = init_params(kp, F)

    y = nn_forward(x, params)
    jax.block_until_ready(y)
    assert y.shape == (B,), y.shape

    y_ref = _reference(x, params)
    max_err = float(jnp.max(jnp.abs(y - y_ref)))
    assert max_err < 1e-4, max_err
    print("KERNEL_OK")
</pallas_src>

<mosaic_0001>
module attributes {stable_mosaic.version = 11 : i64} {
  func.func @_nn_fwd_kernel(%arg0: i32, %arg1: memref<128x32xf32, #tpu.memory_space<vmem>>, %arg2: memref<32x128xf32, #tpu.memory_space<vmem>>, %arg3: memref<1x128xf32, #tpu.memory_space<vmem>>, %arg4: memref<1x128xf32, #tpu.memory_space<vmem>>, %arg5: memref<1x1xf32, #tpu.memory_space<smem>>, %arg6: memref<1x128xf32, #tpu.memory_space<vmem>>) attributes {dimension_semantics = [#tpu.dimension_semantics<parallel>], iteration_bounds = array<i64: 1>, scalar_prefetch = 0 : i64, scratch_operands = 0 : i64, tpu.core_type = #tpu.core_type<tc>, window_params = [{transform_indices = @transform_0, window_bounds = array<i64: 128, 32>}, {pipeline_mode = #tpu.pipeline_mode<synchronous>, transform_indices = @transform_1, window_bounds = array<i64: 32, 128>}, {pipeline_mode = #tpu.pipeline_mode<synchronous>, transform_indices = @transform_2, window_bounds = array<i64: 1, 128>}, {pipeline_mode = #tpu.pipeline_mode<synchronous>, transform_indices = @transform_3, window_bounds = array<i64: 1, 128>}, {transform_indices = @transform_4, window_bounds = array<i64: 1, 1>}, {transform_indices = @transform_5, window_bounds = array<i64: 1, 128>}]} {
    %c0 = arith.constant 0 : index
    %c0_0 = arith.constant 0 : index
    %0 = vector.load %arg1[%c0, %c0_0] : memref<128x32xf32, #tpu.memory_space<vmem>>, vector<128x32xf32>
    %c0_1 = arith.constant 0 : index
    %c0_2 = arith.constant 0 : index
    %1 = vector.load %arg2[%c0_1, %c0_2] : memref<32x128xf32, #tpu.memory_space<vmem>>, vector<32x128xf32>
    %cst = arith.constant dense<0.000000e+00> : vector<128x128xf32>
    %2 = tpu.matmul %0, %1, %cst {dimension_numbers = #tpu.dot_dimension_numbers<[1], [0], [0], [1], [0, 0, 1, 1], [], []>} : vector<128x32xf32>, vector<32x128xf32>, vector<128x128xf32> -> vector<128x128xf32>
    %c0_3 = arith.constant 0 : index
    %c0_4 = arith.constant 0 : index
    %3 = vector.load %arg3[%c0_3, %c0_4] : memref<1x128xf32, #tpu.memory_space<vmem>>, vector<1x128xf32>
    %4 = vector.broadcast %3 : vector<1x128xf32> to vector<128x128xf32>
    %5 = arith.addf %2, %4 : vector<128x128xf32>
    %cst_5 = arith.constant 0.000000e+00 : f32
    %6 = vector.broadcast %cst_5 : f32 to vector<128x128xf32>
    %7 = arith.maximumf %5, %6 : vector<128x128xf32>
    %c0_6 = arith.constant 0 : index
    %c0_7 = arith.constant 0 : index
    %8 = vector.load %arg4[%c0_6, %c0_7] : memref<1x128xf32, #tpu.memory_space<vmem>>, vector<1x128xf32>
    %cst_8 = arith.constant dense<0.000000e+00> : vector<1x128xf32>
    %9 = tpu.matmul %8, %7, %cst_8 {dimension_numbers = #tpu.dot_dimension_numbers<[1], [1], [0], [0], [0, 0, 1, 0], [], []>} : vector<1x128xf32>, vector<128x128xf32>, vector<1x128xf32> -> vector<1x128xf32>
    %c0_9 = arith.constant 0 : index
    %c0_10 = arith.constant 0 : index
    %10 = memref.load %arg5[%c0_9, %c0_10] : memref<1x1xf32, #tpu.memory_space<smem>>
    %11 = vector.broadcast %10 : f32 to vector<1x128xf32>
    %12 = arith.addf %9, %11 : vector<1x128xf32>
    %cst_11 = arith.constant 0.000000e+00 : f32
    %13 = vector.broadcast %cst_11 : f32 to vector<1x128xf32>
    %14 = arith.subf %13, %12 : vector<1x128xf32>
    %15 = math.exp %14 : vector<1x128xf32>
    %cst_12 = arith.constant 1.000000e+00 : f32
    %16 = vector.broadcast %cst_12 : f32 to vector<1x128xf32>
    %17 = arith.addf %16, %15 : vector<1x128xf32>
    %18 = tpu.reciprocal %17 : vector<1x128xf32> -> vector<1x128xf32>
    %c0_13 = arith.constant 0 : index
    %c0_14 = arith.constant 0 : index
    %19 = vector.load %arg6[%c0_13, %c0_14] : memref<1x128xf32, #tpu.memory_space<vmem>>, vector<1x128xf32>
    tpu.vector_store %arg6[%c0_13, %c0_14], %18 {strides = array<i32>} : memref<1x128xf32, #tpu.memory_space<vmem>>, vector<1x128xf32>,
    return
  }
  func.func @transform_0(%arg0: i32) -> (i32, i32) {
    %c0_i32 = arith.constant 0 : i32
    %c0_i32_0 = arith.constant 0 : i32
    return %arg0, %c0_i32 : i32, i32
  }
  func.func @transform_1(%arg0: i32) -> (i32, i32) {
    %c0_i32 = arith.constant 0 : i32
    %c0_i32_0 = arith.constant 0 : i32
    %c0_i32_1 = arith.constant 0 : i32
    return %c0_i32, %c0_i32_0 : i32, i32
  }
  func.func @transform_2(%arg0: i32) -> (i32, i32) {
    %c0_i32 = arith.constant 0 : i32
    %c0_i32_0 = arith.constant 0 : i32
    %c0_i32_1 = arith.constant 0 : i32
    return %c0_i32, %c0_i32_0 : i32, i32
  }
  func.func @transform_3(%arg0: i32) -> (i32, i32) {
    %c0_i32 = arith.constant 0 : i32
    %c0_i32_0 = arith.constant 0 : i32
    %c0_i32_1 = arith.constant 0 : i32
    return %c0_i32, %c0_i32_0 : i32, i32
  }
  func.func @transform_4(%arg0: i32) -> (i32, i32) {
    %c0_i32 = arith.constant 0 : i32
    %c0_i32_0 = arith.constant 0 : i32
    %c0_i32_1 = arith.constant 0 : i32
    return %c0_i32, %c0_i32_0 : i32, i32
  }
  func.func @transform_5(%arg0: i32) -> (i32, i32) {
    %c0_i32 = arith.constant 0 : i32
    %c0_i32_0 = arith.constant 0 : i32
    return %c0_i32, %arg0 : i32, i32
  }
}

</mosaic_0001>

<bundles_post_ra>
// kernel: nn_forward.1
= control target key start
LH: loop header
LB: loop body
LE: loop exit
PB: predicated region body
PF: predicated region fallthrough
CT: control target
= control target key end

     0   :  { %vm45_vm0 = vcmask 261120   ;;  %s368_s1 = inlined_call_operand.vmem [shape: f32[32,128], index: 1, kind: input, shape index: {}]   ;;  %s369_s0 = inlined_call_operand.vmem [shape: f32[8,32], index: 0, kind: input, shape index: {}]   ;;  %s370_s2 = inlined_call_operand.vmem [shape: f32[1,128], index: 2, kind: input, shape index: {}]   ;;  %s371_s3 = inlined_call_operand.vmem [shape: f32[1,128], index: 3, kind: input, shape index: {}]   ;;  %s372_s4 = inlined_call_operand.<no memory space> [shape: f32[1,1], index: 4, kind: input, shape index: {}]   ;;  %s373_s5 = inlined_call_operand.vmem [shape: f32[1,128], index: 5, kind: output, shape index: {}]  }
   0x1   :  { %v40_v0 = vld [vmem:[%s368_s1 + $0x18] sm:$0xff]  ;;  %v39_v1 = vld [vmem:[%s368_s1 + $0x10] sm:$0xff]  ;;  %v38_v2 = vld [vmem:[%s368_s1 + $0x8] sm:$0xff] }
   0x2   :  { %237 = vmatpush.msra.mxu2 %v40_v0  ;;  %238 = vmatpush.msra.mxu3 %v40_v0  ;;  %v37_v3 = vld [vmem:[%s368_s1] sm:$0xff]  ;;  %v27_v4 = vld [vmem:[%s369_s0 + $0x30] sm:$0xff]  ;;  %v28_v7 = vld [vmem:[%s369_s0 + $0x38] sm:$0xff] }
   0x3   :  { %106 = vmatpush.msra.mxu0 %v40_v0  ;;  %v33_v5 = vld [vmem:[%s369_s0 + $0x60] sm:$0xff]  ;;  %v34_v8 = vld [vmem:[%s369_s0 + $0x68] sm:$0xff]  ;;  %v35_v11 = vld [vmem:[%s369_s0 + $0x70] sm:$0xff] }
   0x4   :  { %239 = vmatpush.msra.mxu2 %v39_v1  ;;  %240 = vmatpush.msra.mxu3 %v39_v1  ;;  %v21_v6 = vld [vmem:[%s369_s0] sm:$0xff]  ;;  %v22_v9 = vld [vmem:[%s369_s0 + $0x8] sm:$0xff]  ;;  %v23_v12 = vld [vmem:[%s369_s0 + $0x10] sm:$0xff] }
   0x5   :  { %107 = vmatpush.msra.mxu0 %v39_v1  ;;  %v29_v10 = vld [vmem:[%s369_s0 + $0x40] sm:$0xff]  ;;  %v30_v13 = vld [vmem:[%s369_s0 + $0x48] sm:$0xff]  ;;  %v36_v14 = vld [vmem:[%s369_s0 + $0x78] sm:$0xff] }
   0x6   :  { %241 = vmatpush.msra.mxu2 %v38_v2  ;;  %242 = vmatpush.msra.mxu3 %v38_v2  ;;  %v24_v15 = vld [vmem:[%s369_s0 + $0x18] sm:$0xff]  ;;  %v31_v16 = vld [vmem:[%s369_s0 + $0x50] sm:$0xff]  ;;  %v25_v17 = vld [vmem:[%s369_s0 + $0x20] sm:$0xff] }
   0x7   :  { %108 = vmatpush.msra.mxu0 %v38_v2  ;;  %v32_v18 = vld [vmem:[%s369_s0 + $0x58] sm:$0xff]  ;;  %v26_v19 = vld [vmem:[%s369_s0 + $0x28] sm:$0xff]  ;;  %v245_v28 = vld [vmem:[%s370_s2] ss:$0 sm:$0xff] }
   0x8   :  { %243 = vmatpush.msra.mxu2 %v37_v3  ;;  %244 = vmatpush.msra.mxu3 %v37_v3 }
   0x9   :  { %227 = vmatmul.msk.f32.vlgmr.msra.gmra.mxu2 %vm45_vm0, %v27_v4  ;;  %233 = vmatmul.msk.f32.vlgmr.msra.gmra.mxu3 %vm45_vm0, %v33_v5  ;;  %v175_v5 = vld [vmem:[%s371_s3] sm:$0x1] }
   0xa   :  { %109 = vmatpush.msra.mxu0 %v37_v3 }
   0xb   :  { %221 = vmatmul.msk.f32.vlgmr.msra.gmra.mxu0 %vm45_vm0, %v21_v6  ;;  %v177_v6 = vstv %s372_s4 }
  0x11   :  { %228 = vmatmul.msk.f32.gmra.mxu2 %vm45_vm0, %v28_v7  ;;  %234 = vmatmul.msk.f32.gmra.mxu3 %vm45_vm0, %v34_v8 }
  0x13   :  { %222 = vmatmul.msk.f32.gmra.mxu0 %vm45_vm0, %v22_v9 }
  0x19   :  { %229 = vmatmul.msk.f32.gmra.mxu2 %vm45_vm0, %v29_v10  ;;  %235 = vmatmul.msk.f32.gmra.mxu3 %vm45_vm0, %v35_v11 }
  0x1b   :  { %223 = vmatmul.msk.f32.gmra.mxu0 %vm45_vm0, %v23_v12 }
  0x21   :  { %230 = vmatmul.msk.f32.gmra.mxu2 %vm45_vm0, %v30_v13  ;;  %236 = vmatmul.msk.f32.gmra.mxu3 %vm45_vm0, %v36_v14 }
  0x23   :  { %224 = vmatmul.msk.f32.gmra.mxu0 %vm45_vm0, %v24_v15 }
  0x29   :  { %231 = vmatmul.msk.f32.gmra.mxu2 %vm45_vm0, %v31_v16 }
  0x2b   :  { %225 = vmatmul.msk.f32.gmra.mxu0 %vm45_vm0, %v25_v17 }
  0x31   :  { %232 = vmatmul.msk.f32.gmra.mxu2 %vm45_vm0, %v32_v18 }
  0x33   :  { %226 = vmatmul.msk.f32.gmra.mxu0 %vm45_vm0, %v26_v19 }
  0x88   :  { %v111_v22 = vpop.f32.mrf.mxu0 }
  0x89   :  { %v112_v2 = vadd.f32 %v245_v28, %v111_v22 }
  0x8b   :  { %v159_v4 = vmax.f32 %v112_v2, 0.0 }
  0x8c   :  { %v129_v20 = vpop.f32.mrf.mxu2  ;;  %v147_v21 = vpop.f32.mrf.mxu3 }
  0x8d   :  { %v148_v38 = vadd.f32 %v245_v28, %v147_v21  ;;  %v130_v54 = vadd.f32 %v245_v28, %v129_v20 }
  0x8f   :  { %v171_v41 = vmax.f32 %v148_v38, 0.0  ;;  %v165_v57 = vmax.f32 %v130_v54, 0.0 }
  0x90   :  { %v114_v27 = vpop.f32.mrf.mxu0 }
  0x91   :  { %v115_v0 = vadd.f32 %v245_v28, %v114_v27 }
  0x93   :  { %v160_v3 = vmax.f32 %v115_v0, 0.0 }
  0x94   :  { %v132_v23 = vpop.f32.mrf.mxu2  ;;  %v150_v24 = vpop.f32.mrf.mxu3 }
  0x95   :  { %v151_v35 = vadd.f32 %v245_v28, %v150_v24  ;;  %v133_v51 = vadd.f32 %v245_v28, %v132_v23 }
  0x97   :  { %v172_v39 = vmax.f32 %v151_v35, 0.0  ;;  %v166_v55 = vmax.f32 %v133_v51, 0.0 }
  0x98   :  { %v117_v34 = vpop.f32.mrf.mxu0 }
  0x99   :  { %v118_v62 = vadd.f32 %v245_v28, %v117_v34 }
  0x9b   :  { %v161_v1 = vmax.f32 %v118_v62, 0.0 }
  0x9c   :  { %v135_v25 = vpop.f32.mrf.mxu2  ;;  %v153_v26 = vpop.f32.mrf.mxu3 }
  0x9d   :  { %v154_v32 = vadd.f32 %v245_v28, %v153_v26  ;;  %v136_v49 = vadd.f32 %v245_v28, %v135_v25 }
  0x9f   :  { %v173_v36 = vmax.f32 %v154_v32, 0.0  ;;  %v167_v52 = vmax.f32 %v136_v49, 0.0 }
  0xa0   :  { %v120_v40 = vpop.f32.mrf.mxu0 }
  0xa1   :  { %v121_v60 = vadd.f32 %v245_v28, %v120_v40 }
  0xa3   :  { %v162_v63 = vmax.f32 %v121_v60, 0.0 }
  0xa4   :  { %v138_v29 = vpop.f32.mrf.mxu2  ;;  %v156_v30 = vpop.f32.mrf.mxu3 }
  0xa5   :  { %v157_v31 = vadd.f32 %v245_v28, %v156_v30  ;;  %v139_v46 = vadd.f32 %v245_v28, %v138_v29 }
  0xa7   :  { %v174_v33 = vmax.f32 %v157_v31, 0.0  ;;  %v168_v50 = vmax.f32 %v139_v46, 0.0 }
  0xa8   :  { %v123_v48 = vpop.f32.mrf.mxu0 }
  0xa9   :  { %178 = vmatpush.xpose.msra.mxu1 %v174_v33  ;;  %v124_v59 = vadd.f32 %v245_v28, %v123_v48 }
  0xab   :  { %v163_v61 = vmax.f32 %v124_v59, 0.0 }
  0xac   :  { %v141_v37 = vpop.f32.mrf.mxu2 }
  0xad   :  { %179 = vmatpush.xpose.msra.mxu1 %v173_v36  ;;  %v142_v44 = vadd.f32 %v245_v28, %v141_v37 }
  0xaf   :  { %v169_v47 = vmax.f32 %v142_v44, 0.0 }
  0xb0   :  { %v126_v53 = vpop.f32.mrf.mxu0 }
  0xb1   :  { %180 = vmatpush.xpose.msra.mxu1 %v172_v39  ;;  %v127_v56 = vadd.f32 %v245_v28, %v126_v53 }
  0xb3   :  { %v164_v58 = vmax.f32 %v127_v56, 0.0 }
  0xb4   :  { %v144_v42 = vpop.f32.mrf.mxu2 }
  0xb5   :  { %v145_v43 = vadd.f32 %v245_v28, %v144_v42  ;;  %181 = vmatpush.xpose.msra.mxu1 %v171_v41 }
  0xb7   :  { %v170_v45 = vmax.f32 %v145_v43, 0.0 }
  0xb9   :  { %182 = vmatpush.xpose.msra.mxu1 %v170_v45 }
  0xbd   :  { %183 = vmatpush.xpose.msra.mxu1 %v169_v47 }
  0xc1   :  { %184 = vmatpush.xpose.msra.mxu1 %v168_v50 }
  0xc5   :  { %185 = vmatpush.xpose.msra.mxu1 %v167_v52 }
  0xc9   :  { %186 = vmatpush.xpose.msra.mxu1 %v166_v55 }
  0xcd   :  { %187 = vmatpush.xpose.msra.mxu1 %v165_v57 }
  0xd1   :  { %188 = vmatpush.xpose.msra.mxu1 %v164_v58 }
  0xd5   :  { %189 = vmatpush.xpose.msra.mxu1 %v163_v61 }
  0xd9   :  { %190 = vmatpush.xpose.msra.mxu1 %v162_v63 }
  0xdd   :  { %191 = vmatpush.xpose.msra.mxu1 %v161_v1 }
  0xe1   :  { %192 = vmatpush.xpose.msra.mxu1 %v160_v3 }
  0xe5   :  { %193 = vmatpush.xpose.msra.mxu1 %v159_v4 }
  0xe8   :  { %194 = vmatmul.f32.vlgmr.msra.gmra.mxu1 %v175_v5 }
 0x165   :  { %v195_v7 = vpop.f32.mrf.mxu1 }
 0x166   :  { %v196_v8 = vadd.f32 %v195_v7, %v177_v6 }
 0x168   :  { %v198_v9 = vsub.f32 0.0, %v196_v8 }
 0x16a   :  { %v199_v10 = vmul.f32 1.442695, %v198_v9 }
 0x16c   :  { %246 = vpow2.f32 %v199_v10 }
 0x172   :  { %v247_v11 = vpop.eup %246 }
 0x173   :  { %v201_v12 = vadd.f32 1.0, %v247_v11 }
 0x175   :  { %248 = vrcp.f32 %v201_v12  ;;  %v213_v16 = vand.u32 2147483648, %v201_v12  ;;  %v211_v18 = vand.u32 2147483647, %v201_v12  ;;  %vm207_vm2 = vweird.f32 %v201_v12 }
 0x177   :  { %v214_v20 = vor.u32 1.1754944e-38, %v213_v16  ;;  %vm212_vm4 = vcmp.eq.f32.partialorder %v211_v18, 8.507059e+37 }
 0x17b   :  { %v249_v13 = vpop.eup %248 }
 0x17c   :  { %v203_v14 = vmul.f32 %v249_v13, %v201_v12  ;;  %vm208_vm1 = vweird.f32 %v249_v13 }
 0x17d   :  { %vm209_vm3 = vmor %vm207_vm2, %vm208_vm1 }
 0x17e   :  { %v204_v15 = vsub.f32 1.0, %v203_v14 }
 0x180   :  { %v205_v17 = vmul.f32 %v249_v13, %v204_v15 }
 0x182   :  { %v206_v19 = vadd.f32 %v249_v13, %v205_v17 }
 0x184   :  { %v210_v21 = vsel %vm209_vm3, %v249_v13, %v206_v19 }
 0x185   :  { %v215_v22 = vsel %vm212_vm4, %v214_v20, %v210_v21 }
 0x186   :  { %216 = vst [vmem:[%s373_s5] sm:$0x1] %v215_v22 }

</bundles_post_ra>
